<compile_context>
chip_gen: v5e
topology: v5e:2x2
jax: 0.10.0
libtpu: 0.0.40
codegen_flags: <defaults>
</compile_context>

<pallas_src>
import math

import jax
import jax.numpy as jnp
from jax.experimental import pallas as pl
from jax.experimental.pallas import tpu as pltpu


# --------------------------------------------------------------------------- kernels
def _se_apply_inkernel_kernel(x_ref, sc_ref, wsp_ref, bsp_ref, o_ref):
    # Block: (1, C, t_hw) -- channels on sublanes, pixels on lanes (t_hw % 128 == 0).
    x = x_ref[0]                                                   # (C, t_hw)
    # Spatial branch: 1x1 conv C->1 per pixel == sublane reduce over channels.
    sp = jnp.sum(x * wsp_ref[...], axis=0, keepdims=True) + bsp_ref[0]   # (1, t_hw)
    s_sp = jax.nn.sigmoid(sp)
    # Fused gates: x*s_c + x*s_sp == x*(s_c + s_sp)
    o_ref[0] = x * (sc_ref[0] + s_sp)


def _se_apply_grouped_kernel(x_ref, scg_ref, ssp_ref, e_ref, o_ref):
    # Block: (1, t_g, k*HW) on the grouped view (last dim multiple of 128).
    # Channel gate rebuilt lane-dense via MXU:  (t_g, k) @ (k, k*HW) with E = I_k (x) 1_HW.
    gate_c = jnp.dot(scg_ref[0], e_ref[...],
                     preferred_element_type=jnp.float32,
                     precision=jax.lax.Precision.HIGHEST)          # (t_g, k*HW)
    o_ref[0] = x_ref[0] * (gate_c + ssp_ref[0])                    # ssp broadcasts over rows


def _se_apply_masked_kernel(x_ref, sc_ref, ssp_ref, o_ref):
    # Fallback: purely elementwise, channel-tiled, lane dim = HW (may be masked).
    o_ref[0] = x_ref[0] * (sc_ref[0] + ssp_ref[0])


# --------------------------------------------------------------------- tiling helpers
def _device_caps():
    """(block cap bytes, vmem_limit_bytes) — generation aware, conservative fallback."""
    cap = 8 * 1024 * 1024                 # ~8 MiB blocks: past the DMA plateau everywhere
    limit = 40 * 1024 * 1024              # safe within v7x's 64 MiB/TC VMEM
    try:
        vmem = int(getattr(pltpu.get_tpu_info(), "vmem_capacity_bytes", 0))
        if vmem > 64 * 1024 * 1024:       # v5e / v6e: 128 MiB VMEM
            limit = 64 * 1024 * 1024
    except Exception:
        pass
    return cap, limit


def _select_tile(cands, unit_bytes, cap_bytes, total, min_steps):
    ok = [t for t in cands if t * unit_bytes <= cap_bytes] or [min(cands)]
    pref = [t for t in ok if total // t >= min_steps]
    if pref:
        return max(pref)                  # biggest tile that still feeds the grid
    best_steps = max(total // t for t in ok)
    return max(t for t in ok if total // t == best_steps)


def _pick_lane_tile(total, unit_bytes, cap_bytes, min_steps):
    """Tile along a 128-aligned lane axis (multiple of 128 dividing `total`)."""
    cands = [t for t in range(128, total + 1, 128) if total % t == 0]
    return _select_tile(cands, unit_bytes, cap_bytes, total, min_steps)


def _pick_row_tile(total, unit_bytes, cap_bytes, min_steps):
    """Tile along a sublane axis (multiple of 8 dividing `total`, or the full axis)."""
    cands = [t for t in range(8, total, 8) if total % t == 0] + [total]
    return _select_tile(cands, unit_bytes, cap_bytes, total, min_steps)


# ------------------------------------------------------------------------- entry point
def squeeze_excite_pallas(x_nchw, params):
    """x_nchw: (N, C, H, W) float32. params: see init_params."""
    N, C, H, W = x_nchw.shape
    HW = H * W
    x3 = x_nchw.reshape(N, C, HW)                       # free view (HW contiguous in NCHW)

    cap_bytes, vmem_limit = _device_caps()
    min_steps = max(1, -(-8 // N))                      # aim for >= 8 total grid steps

    # ---- phase A: channel-gate MLP (tiny, batched over N), plain JAX ----
    # TODO(synk): source `pooled` from the producer op when SE is fused into a network.
    pooled = jnp.mean(x3, axis=-1)                                      # (N, C)
    h = jnp.maximum(pooled @ params["w1"] + params["b1"], 0.0)          # (N, hidden)
    s_c = jax.nn.sigmoid(h @ params["w2"] + params["b2"])               # (N, C)

    compiler_params = pltpu.CompilerParams(
        dimension_semantics=("parallel", "parallel"),
        vmem_limit_bytes=vmem_limit,
    )

    # ---------------------------------------------------------------- path A: HW aligned
    if HW % 128 == 0:
        t_hw = _pick_lane_tile(HW, C * 4, cap_bytes, min_steps)
        grid = (N, HW // t_hw)
        out = pl.pallas_call(
            _se_apply_inkernel_kernel,
            out_shape=jax.ShapeDtypeStruct((N, C, HW), jnp.float32),
            grid_spec=pltpu.PrefetchScalarGridSpec(
                num_scalar_prefetch=0,
                grid=grid,
                in_specs=[
                    pl.BlockSpec((1, C, t_hw), lambda n, t: (n, 0, t)),   # x tile
                    pl.BlockSpec((1, C, 1), lambda n, t: (n, 0, 0)),      # s_c (per batch)
                    pl.BlockSpec((C, 1), lambda n, t: (0, 0)),            # w_spatial column
                    pl.BlockSpec(memory_space=pltpu.MemorySpace.SMEM),    # b_spatial scalar
                ],
                out_specs=pl.BlockSpec((1, C, t_hw), lambda n, t: (n, 0, t)),
            ),
            compiler_params=compiler_params,
        )(x3, s_c[:, :, None], params["w_sp"].reshape(C, 1), params["b_sp"])
        return out.reshape(N, C, H, W)

    # HW not 128-aligned: precompute the spatial gate (XLA fuses this channel-reduce
    # with the avg-pool read of x above) so the apply pass can be lane-dense.
    sp = jnp.einsum("nch,c->nh", x3, params["w_sp"],
                    precision=jax.lax.Precision.HIGHEST) + params["b_sp"][0]
    s_sp = jax.nn.sigmoid(sp)                                           # (N, HW)

    # -------------------------------------------------------- path B: grouped lane-dense
    k = 128 // math.gcd(HW, 128)            # channels per group so that k*HW % 128 == 0
    row_bytes = k * HW * 4
    e_bytes = k * row_bytes                 # resident expansion matrix (k, k*HW)
    # VMEM budget: double-buffered in+out blocks (4x), expansion matrix + replicated
    # spatial gate (2x each), ~1 MiB slack.
    blk_cap = min(cap_bytes, (vmem_limit - 2 * e_bytes - 2 * row_bytes - (1 << 20)) // 4)

    if C % k == 0 and row_bytes <= blk_cap:
        G = C // k
        xg = x3.reshape(N, G, k * HW)                                   # free view
        scg = s_c.reshape(N, G, k)
        ssp_rep = jnp.tile(s_sp, (1, k)).reshape(N, 1, k * HW)
        expand = jnp.repeat(jnp.eye(k, dtype=jnp.float32), HW, axis=1)  # (k, k*HW)

        t_g = _pick_row_tile(G, row_bytes, blk_cap, min_steps)
        grid = (N, G // t_g)
        out = pl.pallas_call(
            _se_apply_grouped_kernel,
            out_shape=jax.ShapeDtypeStruct((N, G, k * HW), jnp.float32),
            grid_spec=pltpu.PrefetchScalarGridSpec(
                num_scalar_prefetch=0,
                grid=grid,
                in_specs=[
                    pl.BlockSpec((1, t_g, k * HW), lambda n, g: (n, g, 0)),   # x tile
                    pl.BlockSpec((1, t_g, k), lambda n, g: (n, g, 0)),        # s_c (grouped)
                    pl.BlockSpec((1, 1, k * HW), lambda n, g: (n, 0, 0)),     # s_sp (tiled k x)
                    pl.BlockSpec((k, k * HW), lambda n, g: (0, 0)),           # expansion (resident)
                ],
                out_specs=pl.BlockSpec((1, t_g, k * HW), lambda n, g: (n, g, 0)),
            ),
            compiler_params=compiler_params,
        )(xg, scg, ssp_rep, expand)
        return out.reshape(N, C, H, W)

    # -------------------------------------------- path C: masked fallback (VMEM-capped)
    t_c = _pick_row_tile(C, HW * 4, cap_bytes, min_steps)
    grid = (N, C // t_c)
    out = pl.pallas_call(
        _se_apply_masked_kernel,
        out_shape=jax.ShapeDtypeStruct((N, C, HW), jnp.float32),
        grid_spec=pltpu.PrefetchScalarGridSpec(
            num_scalar_prefetch=0,
            grid=grid,
            in_specs=[
                pl.BlockSpec((1, t_c, HW), lambda n, c: (n, c, 0)),      # x tile
                pl.BlockSpec((1, t_c, 1), lambda n, c: (n, c, 0)),       # s_c
                pl.BlockSpec((1, 1, HW), lambda n, c: (n, 0, 0)),        # s_sp
            ],
            out_specs=pl.BlockSpec((1, t_c, HW), lambda n, c: (n, c, 0)),
        ),
        compiler_params=compiler_params,
    )(x3, s_c[:, :, None], s_sp[:, None, :])
    return out.reshape(N, C, H, W)


# -------------------------------------------------------------------- params / reference
def init_params(key, in_channel, reduction=16):
    hidden = max(1, in_channel // reduction)
    k1, k2, k3, k4, k5, k6 = jax.random.split(key, 6)
    # PyTorch conv1x1 weights (out, in, 1, 1) stored as (in, out) for matmul.
    return {
        "w1": jax.random.normal(k1, (in_channel, hidden), jnp.float32) * 0.1,
        "b1": jax.random.normal(k2, (1, hidden), jnp.float32) * 0.1,
        "w2": jax.random.normal(k3, (hidden, in_channel), jnp.float32) * 0.1,
        "b2": jax.random.normal(k4, (1, in_channel), jnp.float32) * 0.1,
        "w_sp": jax.random.normal(k5, (in_channel,), jnp.float32) * 0.1,
        "b_sp": jax.random.normal(k6, (1,), jnp.float32) * 0.1,
    }


def squeeze_excite_ref(x_nchw, params):
    """Pure-JAX reference mirroring the PyTorch forward (NCHW)."""
    pooled = jnp.mean(x_nchw, axis=(2, 3))                            # (N, C)
    h = jnp.maximum(pooled @ params["w1"] + params["b1"], 0.0)
    s_c = jax.nn.sigmoid(h @ params["w2"] + params["b2"])[:, :, None, None]
    sp = jnp.sum(x_nchw * params["w_sp"][None, :, None, None], axis=1) + params["b_sp"][0]
    s_sp = jax.nn.sigmoid(sp)[:, None, :, :]
    return x_nchw * s_c + x_nchw * s_sp


# ----------------------------------------------------------------------------- main
if __name__ == "__main__":
    key = jax.random.PRNGKey(0)
    cases = [
        (2, 32, 16, 16),    # HW=256          -> lane-aligned path (in-kernel spatial gate)
        (2, 32, 14, 14),    # HW=196, k=32    -> grouped lane-dense path
        (2, 128, 7, 7),     # HW=49,  k=128   -> grouped lane-dense path (MXU gate expand)
        (2, 48, 7, 7),      # HW=49, C%k != 0 -> masked fallback path
    ]
    for idx, (N, C, H, W) in enumerate(cases):
        kx, kp = jax.random.split(jax.random.fold_in(key, idx))
        x = jax.random.normal(kx, (N, C, H, W), jnp.float32)
        params = init_params(kp, C, reduction=16)

        out = jax.block_until_ready(squeeze_excite_pallas(x, params))
        ref = squeeze_excite_ref(x, params)

        assert out.shape == x.shape
        assert jnp.allclose(out, ref, atol=1e-5, rtol=1e-5), f"mismatch vs reference, case {idx}"

    print("KERNEL_OK")
</pallas_src>

<mosaic_0001>
module attributes {stable_mosaic.version = 11 : i64} {
  func.func @_se_apply_inkernel_kernel(%arg0: i32, %arg1: i32, %arg2: memref<1x32x128xf32, #tpu.memory_space<vmem>>, %arg3: memref<1x32x1xf32, #tpu.memory_space<vmem>>, %arg4: memref<32x1xf32, #tpu.memory_space<vmem>>, %arg5: memref<1xf32, #tpu.memory_space<smem>>, %arg6: memref<1x32x128xf32, #tpu.memory_space<vmem>>) attributes {dimension_semantics = [#tpu.dimension_semantics<parallel>, #tpu.dimension_semantics<parallel>], iteration_bounds = array<i64: 2, 2>, scalar_prefetch = 0 : i64, scratch_operands = 0 : i64, tpu.core_type = #tpu.core_type<tc>, window_params = [{transform_indices = @transform_0, window_bounds = array<i64: 1, 32, 128>}, {transform_indices = @transform_1, window_bounds = array<i64: 1, 32, 1>}, {pipeline_mode = #tpu.pipeline_mode<synchronous>, transform_indices = @transform_2, window_bounds = array<i64: 32, 1>}, {transform_indices = @transform_3, window_bounds = array<i64: 1>}, {transform_indices = @transform_4, window_bounds = array<i64: 1, 32, 128>}]} {
    %c0 = arith.constant 0 : index
    %c0_0 = arith.constant 0 : index
    %c0_1 = arith.constant 0 : index
    %0 = vector.load %arg2[%c0, %c0_0, %c0_1] : memref<1x32x128xf32, #tpu.memory_space<vmem>>, vector<1x32x128xf32>
    %1 = vector.shape_cast %0 : vector<1x32x128xf32> to vector<32x128xf32>
    %c0_2 = arith.constant 0 : index
    %c0_3 = arith.constant 0 : index
    %2 = vector.load %arg4[%c0_2, %c0_3] : memref<32x1xf32, #tpu.memory_space<vmem>>, vector<32x1xf32>
    %3 = vector.broadcast %2 : vector<32x1xf32> to vector<32x128xf32>
    %4 = arith.mulf %1, %3 : vector<32x128xf32>
    %cst = arith.constant dense<0.000000e+00> : vector<128xf32>
    %5 = vector.multi_reduction <add>, %4, %cst [0] : vector<32x128xf32> to vector<128xf32>
    %6 = vector.shape_cast %5 : vector<128xf32> to vector<1x128xf32>
    %c0_4 = arith.constant 0 : index
    %7 = memref.load %arg5[%c0_4] : memref<1xf32, #tpu.memory_space<smem>>
    %8 = vector.broadcast %7 : f32 to vector<1x128xf32>
    %9 = arith.addf %6, %8 : vector<1x128xf32>
    %10 = arith.negf %9 : vector<1x128xf32>
    %11 = math.exp %10 : vector<1x128xf32>
    %cst_5 = arith.constant 1.000000e+00 : f32
    %12 = vector.broadcast %cst_5 : f32 to vector<1x128xf32>
    %13 = arith.addf %12, %11 : vector<1x128xf32>
    %14 = arith.divf %12, %13 : vector<1x128xf32>
    %c0_6 = arith.constant 0 : index
    %c0_7 = arith.constant 0 : index
    %c0_8 = arith.constant 0 : index
    %15 = vector.load %arg3[%c0_6, %c0_7, %c0_8] : memref<1x32x1xf32, #tpu.memory_space<vmem>>, vector<1x32x1xf32>
    %16 = vector.shape_cast %15 : vector<1x32x1xf32> to vector<32x1xf32>
    %17 = vector.broadcast %16 : vector<32x1xf32> to vector<32x128xf32>
    %18 = vector.broadcast %14 : vector<1x128xf32> to vector<32x128xf32>
    %19 = arith.addf %17, %18 : vector<32x128xf32>
    %20 = arith.mulf %1, %19 : vector<32x128xf32>
    %c0_9 = arith.constant 0 : index
    %c0_10 = arith.constant 0 : index
    %c0_11 = arith.constant 0 : index
    %21 = vector.load %arg6[%c0_9, %c0_10, %c0_11] : memref<1x32x128xf32, #tpu.memory_space<vmem>>, vector<1x32x128xf32>
    %22 = vector.shape_cast %21 : vector<1x32x128xf32> to vector<32x128xf32>
    %23 = vector.shape_cast %20 : vector<32x128xf32> to vector<1x32x128xf32>
    tpu.vector_store %arg6[%c0_9, %c0_10, %c0_11], %23 {strides = array<i32>} : memref<1x32x128xf32, #tpu.memory_space<vmem>>, vector<1x32x128xf32>,
    return
  }
  func.func @transform_0(%arg0: i32, %arg1: i32) -> (i32, i32, i32) {
    %c0_i32 = arith.constant 0 : i32
    %c0_i32_0 = arith.constant 0 : i32
    return %arg0, %c0_i32, %arg1 : i32, i32, i32
  }
  func.func @transform_1(%arg0: i32, %arg1: i32) -> (i32, i32, i32) {
    %c0_i32 = arith.constant 0 : i32
    %c0_i32_0 = arith.constant 0 : i32
    %c0_i32_1 = arith.constant 0 : i32
    return %arg0, %c0_i32, %c0_i32_0 : i32, i32, i32
  }
  func.func @transform_2(%arg0: i32, %arg1: i32) -> (i32, i32) {
    %c0_i32 = arith.constant 0 : i32
    %c0_i32_0 = arith.constant 0 : i32
    %c0_i32_1 = arith.constant 0 : i32
    return %c0_i32, %c0_i32_0 : i32, i32
  }
  func.func @transform_3(%arg0: i32, %arg1: i32) -> i32 {
    %c0_i32 = arith.constant 0 : i32
    %c0_i32_0 = arith.constant 0 : i32
    return %c0_i32 : i32
  }
  func.func @transform_4(%arg0: i32, %arg1: i32) -> (i32, i32, i32) {
    %c0_i32 = arith.constant 0 : i32
    %c0_i32_0 = arith.constant 0 : i32
    return %arg0, %c0_i32, %arg1 : i32, i32, i32
  }
}

</mosaic_0001>

<bundles_post_ra>
// kernel: tpu_custom_call.1
= control target key start
LH: loop header
LB: loop body
LE: loop exit
PB: predicated region body
PF: predicated region fallthrough
CT: control target
= control target key end

     0   :  { %s917_s0 = inlined_call_operand.hbm [shape: f32[2,32,256], index: 0, kind: input, shape index: {}]   ;;  %s918_s1 = inlined_call_operand.vmem [shape: f32[2,32,1], index: 1, kind: input, shape index: {}]   ;;  %s919_s2 = inlined_call_operand.vmem [shape: f32[32,1], index: 2, kind: input, shape index: {}]   ;;  %s920_s3 = inlined_call_operand.<no memory space> [shape: f32[1], index: 3, kind: input, shape index: {}]   ;;  %s921_s4 = inlined_call_operand.hbm [shape: f32[2,32,256], index: 4, kind: output, shape index: {}]  }
   0x1   :  { %9 = sst [smem:[#allocation2]] %s920_s3 }
   0x2   :  { %10 = vsyncpa [#allocation4], 0 }
   0x3   :  { %12 = vsyncpa [#allocation4 + $0x1], 0 }
   0x4   :  { %13 = vsyncpa [#allocation5], 0 }
   0x5   :  { %15 = vsyncpa [#allocation5 + $0x1], 0  ;;  %s748_s17 = smov 0   ;;  %s750_s18 = smov 0  }
   0x6   :  { %s752_s19 = smov 0   ;;  %s754_s20 = smov 0  }
   0x7   :  { %s756_s21 = smov 0   ;;  %s758_s22 = smov 0  }
   0x8   :  { %s760_s23 = smov 0   ;;  %s762_s24 = smov 0  }
   0x9 LB: > { %s472_s3 = sadd.s32 4294967295, %s711_s24   ;;  %s473_s25 = sadd.s32 4294967294, %s711_s24   ;;  %s711_s24 = sphi %s762_s24, %s21_s24   ;;  %s707_s23 = sphi %s760_s23, %s940_s23   ;;  %s703_s22 = sphi %s758_s22, %s939_s22   ;;  %s699_s21 = sphi %s756_s21, %s938_s21   ;;  %s695_s20 = sphi %s754_s20, %s937_s20   ;;  %s691_s19 = sphi %s752_s19, %s936_s19   ;;  %s687_s18 = sphi %s750_s18, %s935_s18   ;;  %s683_s17 = sphi %s748_s17, %s934_s17  }
   0xa   : > { %s30_s26 = sadd.s32 1, %s703_s22  ;;  %s33_s27 = sadd.s32 1, %s707_s23 }
   0xb   : > { %p31_p0 = scmp.ge.s32.totalorder %s30_s26, 2  ;;  %s42_s28 = sadd.s32 1, %s691_s19 }
   0xc   : > { %p49_p1 = scmp.ne.s32.totalorder %s691_s19, %s687_s18  ;;  %p50_p2 = scmp.eq.s32.totalorder %s711_s24, 0 }
   0xd   : > { %s942_s26 = smov (%p31_p0, %s30_s26), 0  ;;  %s944_s27 = smov (!%p31_p0, %s33_s27), %s707_s23 }
   0xe   : > { %924 = sst [smem:[#allocation9_spill]] %s942_s26  ;;  %s38_s29 = ssub.s32 %s703_s22, %s942_s26 }
   0xf   : > { %p801_p3 = por %p50_p2, %p49_p1  ;;  %p35_p4 = scmp.ge.s32.totalorder %s944_s27, 2 }
  0x10   : > { %p55_p5 = scmp.ne.s32.totalorder %s687_s18, %s683_s17  ;;  %p56_p6 = scmp.eq.s32.totalorder %s472_s3, 0 }
  0x11   : > { %p149_p7 = scmp.eq.s32.totalorder %s472_s3, 3  ;;  %s946_s27 = smov (%p35_p4, %s944_s27), 0 }
  0x12   : > { %926 = sst [smem:[#allocation10_spill]] %s946_s27  ;;  %p809_p8 = por %p56_p6, %p55_p5 }
  0x13   : > { %p813_p9 = por %p149_p7, %p49_p1  ;;  %s37_s7 = ssub.s32 %s707_s23, %s946_s27 }
  0x14   : > { %p155_p10 = scmp.eq.s32.totalorder %s473_s25, 3  ;;  %s39_s8 = sor.u32 %s38_s29, %s37_s7 }
  0x15   : > { %p40_p11 = scmp.eq.s32.totalorder %s39_s8, 0  ;;  %p503_p13 = scmp.lt.s32.totalorder %s711_s24, 4 }
  0x16   : > { %p819_p12 = por %p155_p10, %p55_p5  ;;  %s181_s10 = sand.u32 1, %s691_s19  }
  0x17   : > { %s826_s11 = scalar_select %p40_p11, %s691_s19, %s42_s28  }
  0x18   : > { %s476_s12 = sshll.u32 %s181_s10, 5  ;;  %s477_s13 = sshll.u32 %s707_s23, 3 }
  0x19   : > { %930 = sst [smem:[#allocation11_spill]] %s826_s11  ;;  %s189_s14 = sadd.s32 %s703_s22, %s477_s13 }
  0x1a   : > { %s185_s15 = scalar_lea.vmem [#allocation3], %s476_s12  ;;  %s478_s3 = sshll.u32 %s189_s14, 3 }
  0x1b   : > { %s194_s16 = sshll.u32 %s185_s15, 4  ;;  %s191_s7 = scalar_lea.hbm %s917_s0, %s478_s3  ;;  %s195_s16 = int_to_ptr.vmem [resolvable:$true] %s194_s16 }
  0x1c   : > { %p496_p0 = pnand %p503_p13, %p801_p3  ;;  %s192_s8 = sshll.u32 %s191_s7, 4  ;;  %s193_s8 = int_to_ptr.hbm [resolvable:$true] %s192_s8 }
  0x1d   : > { %s182_s27 = scalar_lea.sflag [#allocation4], %s181_s10  ;;  %s713_s28 = smov 256  }
  0x1e   : > { %s714_s26 = smov 128   ;;  %s715_s11 = smov 8  }
  0x1f   : > { %498 = dma.hbm_to_vmem [thread:$0]  (!%p496_p0), %s193_s8, 512, %s195_s16, %s182_s27, %s713_s28, %s714_s26, %s715_s11  }
  0x20   : > { %p479_p1 = scmp.ge.s32.totalorder %s711_s24, 1  ;;  %p210_p2 = scmp.lt.s32.totalorder %s711_s24, 5 }
  0x22   : > { %p211_p4 = pnand %p479_p1, %p210_p2 }
  0x23   : > { %s838_s12 = sand.u32 (!%p211_p4), 1, %s687_s18  }
  0x24   : > { %214 = sbr.rel (%p211_p4) target bundleno = 230 (0xe6), region = 36  ;;  %s480_s30 = sshll.u32 (!%p211_p4), %s838_s12, 5 }
  0x25   : > { %s217_s13 = scalar_lea.sflag (!%p211_p4), [#allocation4], %s838_s12  ;;  %s844_s14 = scalar_lea.vmem (!%p211_p4), [#allocation3], %s480_s30 }
  0x29   : > { %674 = dma.done.wait (%p809_p8), %s217_s13, 512  }
  0x2a   : > { %676 = vsyncadd (%p809_p8), %s217_s13, 4294966784  ;;  %p251_p3 = scmp.lt.s32.totalorder %s699_s21, 1  ;;  %v716_v0 = vmov 0   ;;  %v262_v1 = vld [vmem:[%s919_s2 + $0x10] sm:$0xff]  ;;  %v260_v2 = vld [vmem:[%s919_s2] sm:$0xff]  ;;  %s297_s13 = sld [smem:[#allocation2]] }
  0x2b   : > { %577 = vset.pattern.permute.xlu1 %v716_v0  ;;  %576 = vset.pattern.permute.xlu0 %v716_v0  ;;  %v263_v4 = vld [vmem:[%s919_s2 + $0x18] sm:$0xff]  ;;  %v261_v5 = vld [vmem:[%s919_s2 + $0x8] sm:$0xff]  ;;  %v256_v11 = vld [vmem:[%s844_s14] sm:$0xff]  ;;  %s356_s5 = scalar_lea.sflag [#allocation5], %s838_s12  ;;  %s633_s7 = scalar_lea.hbm %s921_s4, 128 }
  0x2c   : > { %s252_s26 = scalar_select %p251_p3, %s699_s21, 1  ;;  %578 = vset.pattern.permute.xlu2 %v716_v0  ;;  %276 = vperm.xlu1 %577, %v262_v1   ;;  %v257_v12 = vld [vmem:[%s844_s14 + $0x8] sm:$0xff]  ;;  %v258_v13 = vld [vmem:[%s844_s14 + $0x10] sm:$0xff]  ;;  %v259_v18 = vld [vmem:[%s844_s14 + $0x18] sm:$0xff] }
  0x2d   : > { %266 = vperm.xlu0 %576, %v260_v2   ;;  %s486_s14 = sshll.u32 %s699_s21, 3 }
  0x2e   : > { %s490_s27 = sshll.u32 %s252_s26, 5  ;;  %s366_s26 = sadd.s32 %s695_s20, %s486_s14 }
  0x2f   : > { %s255_s25 = scalar_lea.vmem %s918_s1, %s490_s27  ;;  %s487_s27 = sshll.u32 %s366_s26, 3 }
  0x30   : > { %v319_v3 = vld [vmem:[%s255_s25] sm:$0xff]  ;;  %v320_v6 = vld [vmem:[%s255_s25 + $0x8] sm:$0xff]  ;;  %v322_v7 = vld [vmem:[%s255_s25 + $0x18] sm:$0xff]  ;;  %v298_v29 = vstv %s297_s13  ;;  %s368_s21 = scalar_lea.hbm %s921_s4, %s487_s27  ;;  %s250_s20 = scalar_lea.vmem [#allocation6], %s480_s30 }
  0x31   : > { %325 = vperm.xlu2 %578, %v319_v3   ;;  %v321_v8 = vld [vmem:[%s255_s25 + $0x10] sm:$0xff]  ;;  %s369_s15 = sshll.u32 %s250_s20, 4  ;;  %s371_s16 = sshll.u32 %s368_s21, 4  ;;  %s370_s15 = int_to_ptr.vmem [resolvable:$true] %s369_s15  ;;  %s372_s16 = int_to_ptr.hbm [resolvable:$true] %s371_s16 }
  0x32   : > { %s627_s30 = sshra.s32 %s372_s16, 4  ;;  %s628_s30 = int_to_ptr.hbm [resolvable:$true] %s627_s30 }
  0x33   : > { %s629_s3 = scalar_lea.hbm %s628_s30, 32  ;;  %p634_p8 = scmp.lt.s32.totalorder %s628_s30, %s921_s4 }
  0x34   : > { %281 = vperm.xlu1 %577, %v263_v4   ;;  %p630_p5 = scmp.ne.s32.totalorder %s628_s30, %s629_s3  ;;  %p635_p10 = scmp.lt.s32.totalorder %s633_s7, %s629_s3 }
  0x35   : > { %271 = vperm.xlu0 %576, %v261_v5  }
  0x36   : > { %p631_p6 = pnand %p630_p5, %p813_p9  ;;  %p636_p11 = por %p635_p10, %p634_p8 }
  0x38   : > { %p632_p7 = pneg %p631_p6 }
  0x39   : > { %330 = vperm.xlu2 %578, %v320_v6  }
  0x3a   : > { %p637_p13 = pnand %p636_p11, %p632_p7 }
  0x3c   : > { %340 = vperm.xlu1 %577, %v322_v7  }
  0x3d   : > { %335 = vperm.xlu0 %576, %v321_v8  }
  0x8b   : > { %v326_v36 = vpop.permute.xlu2 %325 }
  0x93   : > { %v331_v48 = vpop.permute.xlu2 %330 }
  0x9e   : > { %v277_v9 = vpop.permute.xlu1 %276 }
  0x9f   : > { %v267_v10 = vpop.permute.xlu0 %266  ;;  %v286_v19 = vmul.f32 %v277_v9, %v258_v13 }
  0xa0   : > { %v284_v15 = vmul.f32 %v267_v10, %v256_v11 }
  0xa6   : > { %v282_v17 = vpop.permute.xlu1 %281 }
  0xa7   : > { %v272_v14 = vpop.permute.xlu0 %271  ;;  %v287_v21 = vmul.f32 %v282_v17, %v259_v18 }
  0xa8   : > { %v285_v16 = vmul.f32 %v272_v14, %v257_v12 }
  0xaa   : > { %v288_v20 = vadd.f32 %v285_v16, %v284_v15 }
  0xac   : > { %v289_v22 = vadd.f32 %v288_v20, %v286_v19 }
  0xae   : > { %v290_v23 = vadd.f32 %v289_v22, %v287_v21  ;;  %v341_v44 = vpop.permute.xlu1 %340 }
  0xaf   : > { %v336_v47 = vpop.permute.xlu0 %335 }
  0xb0   : > { %v291_v24 = vrot.slane %v290_v23, 4 }
  0xb2   : > { %v292_v25 = vadd.f32 %v291_v24, %v290_v23 }
  0xb4   : > { %v293_v26 = vrot.slane %v292_v25, 2 }
  0xb6   : > { %v294_v27 = vadd.f32 %v293_v26, %v292_v25 }
  0xb8   : > { %v295_v28 = vrot.slane %v294_v27, 1 }
  0xba   : > { %v296_v30 = vadd.f32 %v295_v28, %v294_v27 }
  0xbc   : > { %v299_v31 = vadd.f32 %v298_v29, %v296_v30 }
  0xbe   : > { %v484_v32 = vmul.f32 -1.442695, %v299_v31 }
  0xc0   : > { %579 = vpow2.f32 %v484_v32 }
  0xc6   : > { %v580_v33 = vpop.eup %579 }
  0xc7   : > { %v303_v34 = vadd.f32 1.0, %v580_v33 }
  0xc9   : > { %581 = vrcp.f32 %v303_v34  ;;  %v315_v39 = vand.u32 2147483648, %v303_v34  ;;  %v313_v41 = vand.u32 2147483647, %v303_v34  ;;  %vm309_vm1 = vweird.f32 %v303_v34 }
  0xcb   : > { %v316_v43 = vor.u32 1.1754944e-38, %v315_v39  ;;  %vm314_vm3 = vcmp.eq.f32.partialorder %v313_v41, 8.507059e+37 }
  0xcf   : > { %v582_v35 = vpop.eup %581 }
  0xd0   : > { %v305_v37 = vmul.f32 %v582_v35, %v303_v34  ;;  %vm310_vm0 = vweird.f32 %v582_v35 }
  0xd1   : > { %vm311_vm2 = vmor %vm309_vm1, %vm310_vm0 }
  0xd2   : > { %v306_v38 = vsub.f32 1.0, %v305_v37 }
  0xd4   : > { %v307_v40 = vmul.f32 %v582_v35, %v306_v38 }
  0xd6   : > { %v308_v42 = vadd.f32 %v582_v35, %v307_v40 }
  0xd8   : > { %v312_v45 = vsel %vm311_vm2, %v582_v35, %v308_v42 }
  0xd9   : > { %v317_v46 = vsel %vm314_vm3, %v316_v43, %v312_v45 }
  0xda   : > { %v346_v49 = vadd.f32 %v341_v44, %v317_v46  ;;  %v345_v50 = vadd.f32 %v336_v47, %v317_v46  ;;  %v343_v51 = vadd.f32 %v326_v36, %v317_v46  ;;  %v344_v52 = vadd.f32 %v331_v48, %v317_v46 }
  0xdc   : > { %v350_v53 = vmul.f32 %v346_v49, %v259_v18  ;;  %v349_v54 = vmul.f32 %v345_v50, %v258_v13  ;;  %v347_v55 = vmul.f32 %v343_v51, %v256_v11  ;;  %v348_v56 = vmul.f32 %v344_v52, %v257_v12 }
  0xde   : > { %354 = vst [vmem:[%s250_s20 + $0x18] sm:$0xff] %v350_v53 }
  0xdf   : > { %353 = vst [vmem:[%s250_s20 + $0x10] sm:$0xff] %v349_v54 }
  0xe0   : > { %351 = vst [vmem:[%s250_s20] sm:$0xff] %v347_v55 }
  0xe1   : > { %352 = vst [vmem:[%s250_s20 + $0x8] sm:$0xff] %v348_v56 }
  0xe2   : > { %640 = shalt.err (!%p637_p13)
}
  0xe3   : > { %s717_s12 = smov 128   ;;  %s718_s13 = smov 256  }
  0xe4   : > { %s719_s14 = smov 8  }
  0xe5   : > { %493 = dma.vmem_to_hbm [thread:$0]  (%p813_p9), %s370_s15, 512, %s372_s16, %s356_s5, %s717_s12, %s718_s13, %s719_s14  }
  0xe6 PF: > { %p504_p0 = scmp.ge.s32.totalorder %s711_s24, 2  ;;  %s386_s26 = sand.u32 1, %s683_s17  }
  0xe7   : > { %s387_s27 = scalar_lea.sflag [#allocation5], %s386_s26 }
  0xe8   : > { %p500_p1 = pnand %p504_p0, %p819_p12 }
  0xea   : > { %p501_p2 = pneg %p500_p1 }
  0xec   : > { %678 = dma.done.wait (%p501_p2), %s387_s27, 512  }
  0xed   : > { %680 = vsyncadd (%p501_p2), %s387_s27, 4294966784  ;;  %s21_s24 = sadd.s32 1, %s711_s24   ;;  %s931_s10 = sld [smem:[#allocation11_spill]] }
  0xee   : > { %p18_p4 = scmp.ge.s32.totalorder %s21_s24, 6   ;;  %s932_s6 = sld [smem:[#allocation9_spill]] }
  0xef   : > { %s933_s11 = sld [smem:[#allocation10_spill]]  ;;  %s934_s17 = smov %s687_s18 }
  0xf0   : > { %s935_s18 = smov %s691_s19  ;;  %s937_s20 = smov %s703_s22 }
  0xf1   : > { %s938_s21 = smov %s707_s23  ;;  %20 = sbr.rel (!%p18_p4) target bundleno = 9 (0x9), region = 84 }
  0xf3   : > { %s936_s19 = smov %s931_s10 }
  0xf4   : > { %s939_s22 = smov %s932_s6 }
  0xf5   : > { %s940_s23 = smov %s933_s11 }
  0xf6   :  { %393 = vsyncpa [#allocation4], 1 }
  0xf7   :  { %395 = vsyncpa [#allocation4 + $0x1], 1 }
  0xf8   :  { %396 = vsyncpa [#allocation5], 1 }
  0xf9   :  { %398 = vsyncpa [#allocation5 + $0x1], 1 }

</bundles_post_ra>
